<compile_context>
chip_gen: v5e
topology: v5e:2x2
jax: 0.10.0
libtpu: 0.0.40
codegen_flags: <defaults>
</compile_context>

<pallas_src>
import jax
import jax.numpy as jnp
from jax.experimental import pallas as pl
from jax.experimental.pallas import tpu as pltpu


# ----------------------------------------------------------------------------
# Kernel: o = tanh( x @ Wh_p + y @ Wi_p + b )   (all padded to lane-dense H)
# ----------------------------------------------------------------------------
def _input_layers_kernel(x_ref, y_ref, wh_ref, wi_ref, b_ref, o_ref):
    # Two MXU pushes into one f32 accumulator (bf16 operands, f32 accumulate).
    acc = jnp.dot(x_ref[...], wh_ref[...], preferred_element_type=jnp.float32)
    acc = acc + jnp.dot(y_ref[...], wi_ref[...],
                        preferred_element_type=jnp.float32)
    # f32 epilogue: bias add (VPU) + tanh (EUP) co-issue under MXU/stores.
    o_ref[...] = jnp.tanh(acc + b_ref[...]).astype(o_ref.dtype)


def _round_up(n, m):
    return ((n + m - 1) // m) * m


# ----------------------------------------------------------------------------
# One-time weight preparation (hoisted out of the per-call forward path).
# ----------------------------------------------------------------------------
def prepare_params(wh, bh, wi, compute_dtype=jnp.bfloat16):
    """Transpose to (in, out), pad out-dim to a multiple of 128, cast to bf16.

    wh : (hidden, hidden)   hiddenWeight.weight   (PyTorch (out, in) layout)
    bh : (hidden,)          hiddenWeight.bias
    wi : (hidden, D_input)  inputWeight.weight    (out, in), no bias
    """
    hidden = wh.shape[0]
    h_pad = max(128, _round_up(hidden, 128))
    pad = h_pad - hidden
    wh_p = jnp.pad(wh.T, ((0, 0), (0, pad))).astype(compute_dtype)   # (hidden, H_pad)
    wi_p = jnp.pad(wi.T, ((0, 0), (0, pad))).astype(compute_dtype)   # (D_input, H_pad)
    b_p = jnp.pad(bh.reshape(1, -1), ((0, 0), (0, pad))).astype(jnp.float32)
    return wh_p, wi_p, b_p, hidden


# ----------------------------------------------------------------------------
# Forward
# ----------------------------------------------------------------------------
def input_layers_forward(x, y, wh_p, wi_p, b_p, hidden, *, max_tile_b=1024):
    """u = tanh(x @ Wh^T + bh + y @ Wi^T) using pre-padded bf16 weights."""
    B, hid_in = x.shape
    d_input = y.shape[1]
    h_pad = wh_p.shape[1]
    k_total = hid_in + d_input

    # bf16 activations for the MXU (halves input DMA bytes).
    xb = x.astype(wh_p.dtype)
    yb = y.astype(wi_p.dtype)

    def _cost(b_rows):
        return pl.CostEstimate(
            flops=int(2 * b_rows * k_total * h_pad),
            transcendentals=int(b_rows * h_pad),
            bytes_accessed=int(
                b_rows * k_total * 2            # bf16 activations in
                + k_total * h_pad * 2           # bf16 weights
                + h_pad * 4                     # f32 bias
                + b_rows * h_pad * 4            # f32 output
            ),
        )

    if B <= 256:
        # --- tiny batch: single block, no grid / software pipeline ----------
        b_pad = _round_up(max(B, 8), 8)
        if b_pad != B:
            xb = jnp.pad(xb, ((0, b_pad - B), (0, 0)))
            yb = jnp.pad(yb, ((0, b_pad - B), (0, 0)))
        out = pl.pallas_call(
            _input_layers_kernel,
            out_shape=jax.ShapeDtypeStruct((b_pad, h_pad), jnp.float32),
            in_specs=[pl.BlockSpec(memory_space=pltpu.MemorySpace.VMEM)] * 5,
            out_specs=pl.BlockSpec(memory_space=pltpu.MemorySpace.VMEM),
            cost_estimate=_cost(b_pad),
        )(xb, yb, wh_p, wi_p, b_p)
    else:
        # --- larger batch: adaptive batch tiling, parallel grid -------------
        # Smallest step count whose tile fits comfortably in VMEM; at least 2
        # steps so v7x's two TensorCores both get work (no-op on v5e/v6e).
        n_steps = max(2, pl.cdiv(B, max_tile_b))
        tb = _round_up(pl.cdiv(B, n_steps), 8)
        b_pad = n_steps * tb
        if b_pad != B:
            xb = jnp.pad(xb, ((0, b_pad - B), (0, 0)))
            yb = jnp.pad(yb, ((0, b_pad - B), (0, 0)))

        out = pl.pallas_call(
            _input_layers_kernel,
            out_shape=jax.ShapeDtypeStruct((b_pad, h_pad), jnp.float32),
            grid=(n_steps,),
            in_specs=[
                pl.BlockSpec((tb, hid_in), lambda i: (i, 0)),     # x tile
                pl.BlockSpec((tb, d_input), lambda i: (i, 0)),    # y tile
                pl.BlockSpec((hid_in, h_pad), lambda i: (0, 0)),  # Wh (resident)
                pl.BlockSpec((d_input, h_pad), lambda i: (0, 0)), # Wi (resident)
                pl.BlockSpec((1, h_pad), lambda i: (0, 0)),       # bias (resident)
            ],
            out_specs=pl.BlockSpec((tb, h_pad), lambda i: (i, 0)),
            compiler_params=pltpu.CompilerParams(
                dimension_semantics=("parallel",)),
            cost_estimate=_cost(b_pad),
        )(xb, yb, wh_p, wi_p, b_p)

    # Strip batch / lane padding (cheap XLA slice outside the kernel).
    return out[:B, :hidden]


if __name__ == "__main__":
    # Small shapes consistent with the module: x (B, hidden), y (B, D_input).
    B, D_input, hidden = 8, 16, 32

    key = jax.random.PRNGKey(0)
    kx, ky, kwh, kbh, kwi = jax.random.split(key, 5)

    x = jax.random.normal(kx, (B, hidden), dtype=jnp.float32)
    y = jax.random.normal(ky, (B, D_input), dtype=jnp.float32)

    # PyTorch Linear layouts: weight=(out, in), bias=(out,)
    wh = jax.random.normal(kwh, (hidden, hidden), dtype=jnp.float32) * 0.1   # hiddenWeight.weight
    bh = jax.random.normal(kbh, (hidden,), dtype=jnp.float32) * 0.1          # hiddenWeight.bias
    wi = jax.random.normal(kwi, (hidden, D_input), dtype=jnp.float32) * 0.1  # inputWeight.weight

    # One-time weight prep (init-time cost, not per-call).
    wh_p, wi_p, b_p, h = prepare_params(wh, bh, wi)

    # bf16 MXU operands -> compare against the f32 reference with a loose tol.
    TOL = 2e-2

    # --- small batch: single-block (no-grid) path ---------------------------
    out = jax.block_until_ready(input_layers_forward(x, y, wh_p, wi_p, b_p, h))
    ref = jnp.tanh(x @ wh.T + bh + y @ wi.T)
    assert out.shape == ref.shape, "shape mismatch (small batch)"
    assert jnp.allclose(out, ref, atol=TOL, rtol=TOL), "mismatch vs reference (small batch)"

    # --- larger batch: exercises the gridded, adaptively-tiled path ---------
    B2 = 520  # not a multiple of the tile -> also exercises (small) batch pad
    kx2, ky2 = jax.random.split(jax.random.PRNGKey(1), 2)
    x2 = jax.random.normal(kx2, (B2, hidden), dtype=jnp.float32)
    y2 = jax.random.normal(ky2, (B2, D_input), dtype=jnp.float32)
    out2 = jax.block_until_ready(input_layers_forward(x2, y2, wh_p, wi_p, b_p, h))
    ref2 = jnp.tanh(x2 @ wh.T + bh + y2 @ wi.T)
    assert out2.shape == ref2.shape, "shape mismatch (large batch)"
    assert jnp.allclose(out2, ref2, atol=TOL, rtol=TOL), "mismatch vs reference (large batch)"

    print("KERNEL_OK")
</pallas_src>

<mosaic_0001>
module attributes {stable_mosaic.version = 11 : i64} {
  func.func @_input_layers_kernel(%arg0: memref<8x32xbf16, #tpu.memory_space<vmem>>, %arg1: memref<8x16xbf16, #tpu.memory_space<vmem>>, %arg2: memref<32x128xbf16, #tpu.memory_space<vmem>>, %arg3: memref<16x128xbf16, #tpu.memory_space<vmem>>, %arg4: memref<1x128xf32, #tpu.memory_space<vmem>>, %arg5: memref<8x128xf32, #tpu.memory_space<vmem>>) attributes {dimension_semantics = [], scalar_prefetch = 0 : i64, scratch_operands = 0 : i64, tpu.core_type = #tpu.core_type<tc>} {
    %c0 = arith.constant 0 : index
    %c0_0 = arith.constant 0 : index
    %0 = vector.load %arg0[%c0, %c0_0] : memref<8x32xbf16, #tpu.memory_space<vmem>>, vector<8x32xbf16>
    %c0_1 = arith.constant 0 : index
    %c0_2 = arith.constant 0 : index
    %1 = vector.load %arg2[%c0_1, %c0_2] : memref<32x128xbf16, #tpu.memory_space<vmem>>, vector<32x128xbf16>
    %cst = arith.constant dense<0.000000e+00> : vector<8x128xf32>
    %2 = tpu.matmul %0, %1, %cst {dimension_numbers = #tpu.dot_dimension_numbers<[1], [0], [0], [1], [0, 0, 1, 1], [], []>} : vector<8x32xbf16>, vector<32x128xbf16>, vector<8x128xf32> -> vector<8x128xf32>
    %c0_3 = arith.constant 0 : index
    %c0_4 = arith.constant 0 : index
    %3 = vector.load %arg1[%c0_3, %c0_4] : memref<8x16xbf16, #tpu.memory_space<vmem>>, vector<8x16xbf16>
    %c0_5 = arith.constant 0 : index
    %c0_6 = arith.constant 0 : index
    %4 = vector.load %arg3[%c0_5, %c0_6] : memref<16x128xbf16, #tpu.memory_space<vmem>>, vector<16x128xbf16>
    %cst_7 = arith.constant dense<0.000000e+00> : vector<8x128xf32>
    %5 = tpu.matmul %3, %4, %cst_7 {dimension_numbers = #tpu.dot_dimension_numbers<[1], [0], [0], [1], [0, 0, 1, 1], [], []>} : vector<8x16xbf16>, vector<16x128xbf16>, vector<8x128xf32> -> vector<8x128xf32>
    %6 = arith.addf %2, %5 : vector<8x128xf32>
    %c0_8 = arith.constant 0 : index
    %c0_9 = arith.constant 0 : index
    %7 = vector.load %arg4[%c0_8, %c0_9] : memref<1x128xf32, #tpu.memory_space<vmem>>, vector<1x128xf32>
    %8 = vector.broadcast %7 : vector<1x128xf32> to vector<8x128xf32>
    %9 = arith.addf %6, %8 : vector<8x128xf32>
    %10 = math.tanh %9 : vector<8x128xf32>
    %c0_10 = arith.constant 0 : index
    %c0_11 = arith.constant 0 : index
    %11 = vector.load %arg5[%c0_10, %c0_11] : memref<8x128xf32, #tpu.memory_space<vmem>>, vector<8x128xf32>
    tpu.vector_store %arg5[%c0_10, %c0_11], %10 {strides = array<i32>} : memref<8x128xf32, #tpu.memory_space<vmem>>, vector<8x128xf32>,
    return
  }
}

</mosaic_0001>

<bundles_post_ra>
// kernel: tpu_custom_call.1
= control target key start
LH: loop header
LB: loop body
LE: loop exit
PB: predicated region body
PF: predicated region fallthrough
CT: control target
= control target key end

     0   :  { %10 = vsyncpa [#allocation3], 0  ;;  %s377_s0 = inlined_call_operand.hbm [shape: bf16[8,32], index: 0, kind: input, shape index: {}]   ;;  %s378_s1 = inlined_call_operand.hbm [shape: bf16[8,16], index: 1, kind: input, shape index: {}]   ;;  %s379_s2 = inlined_call_operand.hbm [shape: bf16[32,128], index: 2, kind: input, shape index: {}]   ;;  %s380_s3 = inlined_call_operand.hbm [shape: bf16[16,128], index: 3, kind: input, shape index: {}]   ;;  %s381_s4 = inlined_call_operand.vmem [shape: f32[1,128], index: 4, kind: input, shape index: {}]   ;;  %s382_s5 = inlined_call_operand.hbm [shape: f32[8,128], index: 5, kind: output, shape index: {}]  }
   0x1   :  { %11 = vsyncpa [#allocation6], 0 }
   0x2   :  { %12 = vsyncpa [#allocation9], 0  ;;  %s30_s20 = sshll.u32 %s378_s1, 4  ;;  %s31_s20 = int_to_ptr.hbm [resolvable:$true] %s30_s20 }
   0x3   :  { %13 = vsyncpa [#allocation4], 0  ;;  %s322_s21 = smov [#allocation5]   ;;  %s19_s25 = sshll.u32 %s377_s0, 4  ;;  %s20_s25 = int_to_ptr.hbm [resolvable:$true] %s19_s25 }
   0x4   :  { %s32_s22 = sshll.u32 %s322_s21, 4  ;;  %s323_s26 = smov [#allocation2]   ;;  %s33_s22 = int_to_ptr.vmem [resolvable:$true] %s32_s22 }
   0x5   :  { %35 = dma.hbm_to_vmem [thread:$0]  %s31_s20, 64, %s33_s22, [#allocation6]  }
   0x6   :  { %s21_s27 = sshll.u32 %s323_s26, 4  ;;  %s40_s30 = sshll.u32 %s379_s2, 4  ;;  %s22_s27 = int_to_ptr.vmem [resolvable:$true] %s21_s27  ;;  %s41_s30 = int_to_ptr.hbm [resolvable:$true] %s40_s30 }
   0x7   :  { %24 = dma.hbm_to_vmem [thread:$0]  %s20_s25, 64, %s22_s27, [#allocation3]  }
   0x8   :  { %s324_s1 = smov [#allocation7]   ;;  %s53_s9 = sshll.u32 %s380_s3, 4  ;;  %s54_s9 = int_to_ptr.hbm [resolvable:$true] %s53_s9 }
   0x9   :  { %s42_s6 = sshll.u32 %s324_s1, 4  ;;  %s325_s10 = smov 64   ;;  %s43_s6 = int_to_ptr.vmem [resolvable:$true] %s42_s6 }
   0xa   :  { %s326_s0 = smov 4   ;;  %s327_s11 = smov [#allocation8]  }
   0xb   :  { %48 = dma.hbm_to_vmem [thread:$0]  %s41_s30, 256, %s43_s6, [#allocation6], %s325_s10, %s325_s10, %s326_s0  }
   0xc   :  { %s55_s12 = sshll.u32 %s327_s11, 4  ;;  %s56_s12 = int_to_ptr.vmem [resolvable:$true] %s55_s12 }
   0xd   :  { %61 = dma.hbm_to_vmem [thread:$0]  %s54_s9, 128, %s56_s12, [#allocation9], %s325_s10, %s325_s10, %s326_s0  }
   0xe   :  { %314 = dma.done.wait [#allocation3], 64  }
   0xf   :  { %315 = vsyncadd [#allocation3], 4294967232 }
  0x10   :  { %316 = dma.done.wait [#allocation6], 320  }
  0x11   :  { %317 = vsyncadd [#allocation6], 4294966976 }
  0x12   :  { %318 = dma.done.wait [#allocation9], 128  }
  0x13   :  { %319 = vsyncadd [#allocation9], 4294967168  ;;  %v183_v0 = vld [vmem:[#allocation8] sm:$0xff]  ;;  %v182_v1 = vld [vmem:[#allocation7 + $0x8] sm:$0xff]  ;;  %vm95_vm0 = vcmask 130048   ;;  %vm124_vm1 = vcmask 261120  }
  0x14   :  { %106 = vmatpush.bf16.msra.mxu0 %v183_v0  ;;  %134 = vmatpush.bf16.msra.mxu1 %v182_v1  ;;  %v86_v2 = vld [vmem:[#allocation5] sm:$0xf]  ;;  %v181_v3 = vld [vmem:[#allocation7] sm:$0xff]  ;;  %v81_v4 = vld [vmem:[#allocation2] sm:$0xf]  ;;  %s328_s13 = smov [#allocation10]  }
  0x15   :  { %v191_v6 = vld [vmem:[%s381_s4] ss:$0 sm:$0xff]  ;;  %s153_s14 = sshll.u32 %s328_s13, 4  ;;  %s155_s17 = sshll.u32 %s382_s5, 4  ;;  %s154_s14 = int_to_ptr.vmem [resolvable:$true] %s153_s14  ;;  %s156_s17 = int_to_ptr.hbm [resolvable:$true] %s155_s17 }
  0x17   :  { %171 = vmatmul.msk.bf16.vlgmr.msra.gmra.mxu0 %vm95_vm0, %v86_v2 }
  0x18   :  { %135 = vmatpush.bf16.msra.mxu1 %v181_v3 }
  0x1b   :  { %180 = vmatmul.msk.bf16.vlgmr.msra.gmra.mxu1 %vm124_vm1, %v81_v4 }
  0x94   :  { %v108_v5 = vpop.f32.mrf.mxu0 }
  0x98   :  { %v137_v7 = vpop.f32.mrf.mxu1 }
  0x99   :  { %v138_v8 = vadd.f32 %v137_v7, %v108_v5 }
  0x9b   :  { %v145_v9 = vadd.f32 %v191_v6, %v138_v8 }
  0x9c   :  { %v110_v10 = vpop.f32.mrf.mxu0 }
  0x9d   :  { %192 = vtanh.f32 %v145_v9 }
  0xa0   :  { %v139_v11 = vpop.f32.mrf.mxu1 }
  0xa3   :  { %v193_v12 = vpop.eup %192 }
  0xa4   :  { %147 = vst [vmem:[#allocation10] sm:$0xff] %v193_v12 }
  0xa5   :  { %158 = dma.vmem_to_hbm [thread:$0]  %s154_s14, 128, %s156_s17, [#allocation4]  }
  0xa6   :  { %320 = dma.done.wait [#allocation4], 128  }
  0xa7   :  { %321 = vsyncadd [#allocation4], 4294967168 }
  0xa8   :  { %163 = vsyncpa [#allocation3], 1 }
  0xa9   :  { %164 = vsyncpa [#allocation6], 1 }
  0xaa   :  { %165 = vsyncpa [#allocation9], 1 }
  0xab   :  { %166 = vsyncpa [#allocation4], 1 }

</bundles_post_ra>
